<compile_context>
chip_gen: v5e
topology: v5e:2x2
jax: 0.10.0
libtpu: 0.0.40
codegen_flags: <defaults>
</compile_context>

<pallas_src>
import jax
import jax.numpy as jnp
from jax.experimental import pallas as pl
from jax.experimental.pallas import tpu as pltpu


_DEFAULT_TILE_N = 65536  # lane-dense tile width (multiple of 128)


def _tile_masked_nll(logits_ref, tgt_ref, *, tile_n, n_valid):
    """Masked per-column NLL for one (C, tile_n) tile -> (1, tile_n) f32."""
    step = pl.program_id(0)
    logits = logits_ref[...].astype(jnp.float32)                      # (C, TN)
    # numerically stable log-softmax along the class (sublane) axis
    m = jnp.max(logits, axis=0, keepdims=True)                        # (1, TN)
    shifted = logits - m
    lse = jnp.log(jnp.sum(jnp.exp(shifted), axis=0, keepdims=True))   # (1, TN)
    # pick the target-class logit with compare+select over the C sublanes
    # (out-of-range targets silently give nll = lse instead of erroring like
    #  torch.nn.CrossEntropyLoss does)
    cls = jax.lax.broadcasted_iota(jnp.int32, logits.shape, 0)        # (C, TN)
    picked = jnp.sum(jnp.where(cls == tgt_ref[...], shifted, 0.0),
                     axis=0, keepdims=True)                           # (1, TN)
    nll = lse - picked                                                # (1, TN)
    # mask the ragged tail of the last block by global column index; use a
    # select (jnp.where), never a 0-weight multiply: OOB tile contents are
    # unspecified and 0*NaN would poison the accumulator
    col = step * tile_n + jax.lax.broadcasted_iota(jnp.int32, (1, tile_n), 1)
    return jnp.where(col < n_valid, nll, 0.0)


def _make_accum_kernel(n_valid, inv_n, tile_n):
    """Single-TensorCore variant: resident VMEM accumulator over the N grid."""
    def kernel(logits_ref, tgt_ref, out_ref, acc_ref):
        step = pl.program_id(0)

        @pl.when(step == 0)
        def _init():
            acc_ref[...] = jnp.zeros_like(acc_ref)

        acc_ref[...] += _tile_masked_nll(logits_ref, tgt_ref,
                                         tile_n=tile_n, n_valid=n_valid)

        @pl.when(step == pl.num_programs(0) - 1)
        def _finalize():
            out_ref[0, 0] = jnp.sum(acc_ref[...]) * inv_n

    return kernel


def _make_partial_kernel(n_valid, tile_n):
    """v7x variant: per-tile partial sums, 'parallel' grid, reduce in wrapper."""
    def kernel(logits_ref, tgt_ref, out_ref):
        masked = _tile_masked_nll(logits_ref, tgt_ref,
                                  tile_n=tile_n, n_valid=n_valid)
        # broadcast the tile sum across a lane-dense (1, 128) output row
        out_ref[...] = jnp.full((1, 128), jnp.sum(masked), jnp.float32)

    return kernel


def _is_multicore_chip():
    """True if the default device looks like a multi-TensorCore chip (v7x)."""
    try:
        kind = jax.devices()[0].device_kind.lower()
    except Exception:
        return False
    return ("v7" in kind) or ("7x" in kind)


def _mean_cross_entropy(logits_cn, targets, *, tile_n, parallel_partials):
    """Mean cross-entropy over the N columns of class-major (C, N) logits."""
    c, n = logits_cn.shape
    if n == 0:
        # torch's mean reduction over an empty batch is also NaN
        return jnp.asarray(jnp.nan, jnp.float32)

    # keep the block no wider than the (128-rounded) problem: tiny batches stay
    # cheap, large-N streams keep the full amortising tile width
    tile_n = max(128, min(int(tile_n), pl.cdiv(n, 128) * 128))
    num_tiles = pl.cdiv(n, tile_n)
    targets2d = targets.astype(jnp.int32).reshape(1, n)     # lane-dense (1, N)
    inv_n = 1.0 / n

    in_specs = [
        pl.BlockSpec((c, tile_n), lambda i: (0, i)),   # logits  (C, TN), native dtype
        pl.BlockSpec((1, tile_n), lambda i: (0, i)),   # targets (1, TN), int32
    ]

    if parallel_partials and num_tiles > 1:
        # v7x: independent per-tile partials so both TensorCores stream HBM
        out = pl.pallas_call(
            _make_partial_kernel(n, tile_n),
            out_shape=jax.ShapeDtypeStruct((num_tiles, 128), jnp.float32),
            grid=(num_tiles,),
            in_specs=in_specs,
            out_specs=pl.BlockSpec((1, 128), lambda i: (i, 0)),
            compiler_params=pltpu.CompilerParams(
                dimension_semantics=("parallel",)),
        )(logits_cn, targets2d)
        return jnp.sum(out[:, 0]) * inv_n

    # v5e/v6e (single TensorCore): resident accumulator over the reduction grid
    out = pl.pallas_call(
        _make_accum_kernel(n, inv_n, tile_n),
        out_shape=jax.ShapeDtypeStruct((1, 1), jnp.float32),
        grid=(num_tiles,),
        in_specs=in_specs,
        out_specs=pl.BlockSpec((1, 1), lambda i: (0, 0),
                               memory_space=pltpu.MemorySpace.SMEM),
        scratch_shapes=[pltpu.VMEM((1, tile_n), jnp.float32)],
        compiler_params=pltpu.CompilerParams(
            dimension_semantics=("arbitrary",)),       # reduction over N tiles
    )(logits_cn, targets2d)
    return out[0, 0]


def consistency_loss(labeled_yProba, labeled_yTrue,
                     unlabeled_yProba, unlabeled_yPred, lamda,
                     *, tile_n=_DEFAULT_TILE_N):
    """JAX/Pallas equivalent of consistencyLoss(lamda).forward(...).

    labeled_yProba:   (Nl, C) float logits
    labeled_yTrue:    (Nl,)   targets (any numeric dtype; cast like torch.long)
    unlabeled_yProba: (Nu, C) float logits
    unlabeled_yPred:  (Nu,)   pseudo-label targets
    lamda:            Python or traced scalar weight on the unlabeled CE term
    """
    nl, c = labeled_yProba.shape
    nu, cu = unlabeled_yProba.shape
    assert c == cu, "labeled/unlabeled logits must share the class dimension"

    parallel = _is_multicore_chip()
    # TODO(synk): if upstream can emit class-major (C, N) logits directly, the
    # .T below (one extra XLA read+write pass over each logits array) vanishes.
    ce_lab = _mean_cross_entropy(labeled_yProba.T, labeled_yTrue,
                                 tile_n=tile_n, parallel_partials=parallel)
    ce_unl = _mean_cross_entropy(unlabeled_yProba.T, unlabeled_yPred,
                                 tile_n=tile_n, parallel_partials=parallel)
    # jnp.asarray keeps this jit-safe when lamda is a traced scalar
    return ce_lab + jnp.asarray(lamda, jnp.float32) * ce_unl


def _reference_loss(lab_logits, lab_tgt, unlab_logits, unlab_tgt, lamda):
    def ce(logits, tgt):
        logp = jax.nn.log_softmax(logits.astype(jnp.float32), axis=-1)
        picked = jnp.take_along_axis(
            logp, tgt.astype(jnp.int32)[:, None], axis=-1)[:, 0]
        return -jnp.mean(picked)
    return ce(lab_logits, lab_tgt) + lamda * ce(unlab_logits, unlab_tgt)


if __name__ == "__main__":
    key = jax.random.PRNGKey(0)
    k1, k2, k3, k4 = jax.random.split(key, 4)

    # small shapes consistent with the module: 3 classes, a handful of samples
    NL, NU, C = 8, 8, 3
    lamda = 0.5

    labeled_yProba = jax.random.normal(k1, (NL, C), dtype=jnp.float32)
    labeled_yTrue = jax.random.randint(k2, (NL,), 0, C).astype(jnp.float32)  # float, like the torch code
    unlabeled_yProba = jax.random.normal(k3, (NU, C), dtype=jnp.float32)
    unlabeled_yPred = jax.random.randint(k4, (NU,), 0, C).astype(jnp.float32)

    loss = consistency_loss(labeled_yProba, labeled_yTrue,
                            unlabeled_yProba, unlabeled_yPred, lamda)
    loss = jax.block_until_ready(loss)
    ref = _reference_loss(labeled_yProba, labeled_yTrue,
                          unlabeled_yProba, unlabeled_yPred, lamda)
    assert jnp.allclose(loss, ref, rtol=1e-5, atol=1e-5), (loss, ref)

    # second, slightly larger ragged case that exercises the multi-tile grid,
    # the in-kernel ragged-tail masking and the per-tile accumulation path
    k5, k6, k7, k8 = jax.random.split(jax.random.PRNGKey(1), 4)
    NL2, NU2 = 300, 200
    lab_p2 = jax.random.normal(k5, (NL2, C), dtype=jnp.float32)
    lab_t2 = jax.random.randint(k6, (NL2,), 0, C).astype(jnp.float32)
    unl_p2 = jax.random.normal(k7, (NU2, C), dtype=jnp.float32)
    unl_t2 = jax.random.randint(k8, (NU2,), 0, C).astype(jnp.float32)
    loss2 = jax.block_until_ready(
        consistency_loss(lab_p2, lab_t2, unl_p2, unl_t2, lamda, tile_n=128))
    ref2 = _reference_loss(lab_p2, lab_t2, unl_p2, unl_t2, lamda)
    assert jnp.allclose(loss2, ref2, rtol=1e-5, atol=1e-5), (loss2, ref2)

    print("KERNEL_OK")
</pallas_src>

<mosaic_0001>
module attributes {stable_mosaic.version = 11 : i64} {
  func.func @kernel(%arg0: i32, %arg1: memref<3x128xf32, #tpu.memory_space<vmem>>, %arg2: memref<1x128xi32, #tpu.memory_space<vmem>>, %arg3: memref<1x1xf32, #tpu.memory_space<smem>>, %arg4: memref<1x128xf32, #tpu.memory_space<vmem>>) attributes {dimension_semantics = [#tpu.dimension_semantics<arbitrary>], iteration_bounds = array<i64: 1>, scalar_prefetch = 0 : i64, scratch_operands = 1 : i64, tpu.core_type = #tpu.core_type<tc>, window_params = [{transform_indices = @transform_0, window_bounds = array<i64: 3, 128>}, {transform_indices = @transform_1, window_bounds = array<i64: 1, 128>}, {transform_indices = @transform_2, window_bounds = array<i64: 1, 1>}]} {
    %c0_i32 = arith.constant 0 : i32
    %0 = arith.cmpi eq, %arg0, %c0_i32 : i32
    %1 = arith.extui %0 : i1 to i32
    %c0_i32_0 = arith.constant 0 : i32
    %2 = arith.cmpi ne, %1, %c0_i32_0 : i32
    scf.if %2 {
      %cst_14 = arith.constant 0.000000e+00 : f32
      %35 = vector.broadcast %cst_14 : f32 to vector<1x128xf32>
      %c0_15 = arith.constant 0 : index
      %c0_16 = arith.constant 0 : index
      %36 = vector.load %arg4[%c0_15, %c0_16] : memref<1x128xf32, #tpu.memory_space<vmem>>, vector<1x128xf32>
      tpu.vector_store %arg4[%c0_15, %c0_16], %35 {strides = array<i32>} : memref<1x128xf32, #tpu.memory_space<vmem>>, vector<1x128xf32>,
    } else {
    }
    %c0 = arith.constant 0 : index
    %c0_1 = arith.constant 0 : index
    %3 = vector.load %arg4[%c0, %c0_1] : memref<1x128xf32, #tpu.memory_space<vmem>>, vector<1x128xf32>
    %c0_2 = arith.constant 0 : index
    %c0_3 = arith.constant 0 : index
    %4 = vector.load %arg1[%c0_2, %c0_3] : memref<3x128xf32, #tpu.memory_space<vmem>>, vector<3x128xf32>
    %cst = arith.constant dense<0xFF800000> : vector<128xf32>
    %5 = vector.multi_reduction <maximumf>, %4, %cst [0] : vector<3x128xf32> to vector<128xf32>
    %6 = vector.shape_cast %5 : vector<128xf32> to vector<1x128xf32>
    %7 = vector.broadcast %6 : vector<1x128xf32> to vector<3x128xf32>
    %8 = arith.subf %4, %7 : vector<3x128xf32>
    %9 = math.exp %8 : vector<3x128xf32>
    %cst_4 = arith.constant dense<0.000000e+00> : vector<128xf32>
    %10 = vector.multi_reduction <add>, %9, %cst_4 [0] : vector<3x128xf32> to vector<128xf32>
    %11 = vector.shape_cast %10 : vector<128xf32> to vector<1x128xf32>
    %12 = math.log %11 : vector<1x128xf32>
    %13 = tpu.iota {dimensions = array<i32: 0>} : vector<3x128xi32>
    %c0_5 = arith.constant 0 : index
    %c0_6 = arith.constant 0 : index
    %14 = vector.load %arg2[%c0_5, %c0_6] : memref<1x128xi32, #tpu.memory_space<vmem>>, vector<1x128xi32>
    %15 = vector.broadcast %14 : vector<1x128xi32> to vector<3x128xi32>
    %16 = arith.cmpi eq, %13, %15 : vector<3x128xi32>
    %cst_7 = arith.constant 0.000000e+00 : f32
    %17 = vector.broadcast %cst_7 : f32 to vector<3x128xf32>
    %18 = arith.select %16, %8, %17 : vector<3x128xi1>, vector<3x128xf32>
    %cst_8 = arith.constant dense<0.000000e+00> : vector<128xf32>
    %19 = vector.multi_reduction <add>, %18, %cst_8 [0] : vector<3x128xf32> to vector<128xf32>
    %20 = vector.shape_cast %19 : vector<128xf32> to vector<1x128xf32>
    %21 = arith.subf %12, %20 : vector<1x128xf32>
    %c128_i32 = arith.constant 128 : i32
    %22 = arith.muli %arg0, %c128_i32 : i32
    %23 = tpu.iota {dimensions = array<i32: 1>} : vector<1x128xi32>
    %24 = vector.broadcast %22 : i32 to vector<1x128xi32>
    %25 = arith.addi %24, %23 : vector<1x128xi32>
    %c8_i32 = arith.constant 8 : i32
    %26 = vector.broadcast %c8_i32 : i32 to vector<1x128xi32>
    %27 = arith.cmpi slt, %25, %26 : vector<1x128xi32>
    %cst_9 = arith.constant 0.000000e+00 : f32
    %28 = vector.broadcast %cst_9 : f32 to vector<1x128xf32>
    %29 = arith.select %27, %21, %28 : vector<1x128xi1>, vector<1x128xf32>
    %30 = arith.addf %3, %29 : vector<1x128xf32>
    %c0_10 = arith.constant 0 : index
    %c0_11 = arith.constant 0 : index
    %31 = vector.load %arg4[%c0_10, %c0_11] : memref<1x128xf32, #tpu.memory_space<vmem>>, vector<1x128xf32>
    tpu.vector_store %arg4[%c0_10, %c0_11], %30 {strides = array<i32>} : memref<1x128xf32, #tpu.memory_space<vmem>>, vector<1x128xf32>,
    %c0_i32_12 = arith.constant 0 : i32
    %32 = arith.cmpi eq, %arg0, %c0_i32_12 : i32
    %33 = arith.extui %32 : i1 to i32
    %c0_i32_13 = arith.constant 0 : i32
    %34 = arith.cmpi ne, %33, %c0_i32_13 : i32
    scf.if %34 {
      %c0_14 = arith.constant 0 : index
      %c0_15 = arith.constant 0 : index
      %35 = vector.load %arg4[%c0_14, %c0_15] : memref<1x128xf32, #tpu.memory_space<vmem>>, vector<1x128xf32>
      %36 = vector.shape_cast %35 : vector<1x128xf32> to vector<1x1x128xf32>
      %cst_16 = arith.constant dense<0.000000e+00> : vector<1xf32>
      %37 = vector.multi_reduction <add>, %36, %cst_16 [1, 2] : vector<1x1x128xf32> to vector<1xf32>
      %38 = vector.shape_cast %37 : vector<1xf32> to vector<1x1x1xf32>
      %39 = vector.extract %38[0, 0, 0] : f32 from vector<1x1x1xf32>
      %cst_17 = arith.constant 1.250000e-01 : f32
      %40 = arith.mulf %39, %cst_17 : f32
      %c0_18 = arith.constant 0 : index
      %c0_19 = arith.constant 0 : index
      %41 = memref.load %arg3[%c0_18, %c0_19] : memref<1x1xf32, #tpu.memory_space<smem>>
      memref.store %40, %arg3[%c0_18, %c0_19] : memref<1x1xf32, #tpu.memory_space<smem>>
    } else {
    }
    return
  }
  func.func @transform_0(%arg0: i32) -> (i32, i32) {
    %c0_i32 = arith.constant 0 : i32
    %c0_i32_0 = arith.constant 0 : i32
    return %c0_i32, %arg0 : i32, i32
  }
  func.func @transform_1(%arg0: i32) -> (i32, i32) {
    %c0_i32 = arith.constant 0 : i32
    %c0_i32_0 = arith.constant 0 : i32
    return %c0_i32, %arg0 : i32, i32
  }
  func.func @transform_2(%arg0: i32) -> (i32, i32) {
    %c0_i32 = arith.constant 0 : i32
    %c0_i32_0 = arith.constant 0 : i32
    %c0_i32_1 = arith.constant 0 : i32
    return %c0_i32, %c0_i32_0 : i32, i32
  }
}

</mosaic_0001>

<bundles_post_ra>
// kernel: tpu_custom_call.1
= control target key start
LH: loop header
LB: loop body
LE: loop exit
PB: predicated region body
PF: predicated region fallthrough
CT: control target
= control target key end

     0   :  { %7 = vsyncpa [#allocation4], 0  ;;  %s233_s0 = inlined_call_operand.hbm [shape: f32[3,8], index: 0, kind: input, shape index: {}]   ;;  %s234_s1 = inlined_call_operand.hbm [shape: s32[1,8], index: 1, kind: input, shape index: {}]   ;;  %s235_s2 = inlined_call_operand.hbm [shape: f32[1,1], index: 2, kind: output, shape index: {}]  }
   0x1   :  { %8 = vsyncpa [#allocation7], 0 }
   0x2   :  { %9 = vsyncpa [#allocation5], 0  ;;  %s15_s11 = sshll.u32 %s233_s0, 4  ;;  %s202_s12 = smov [#allocation3]   ;;  %s16_s11 = int_to_ptr.hbm [resolvable:$true] %s15_s11 }
   0x3   :  { %s17_s13 = sshll.u32 %s202_s12, 4  ;;  %s26_s16 = sshll.u32 %s234_s1, 4  ;;  %s18_s13 = int_to_ptr.vmem [resolvable:$true] %s17_s13  ;;  %s27_s16 = int_to_ptr.hbm [resolvable:$true] %s26_s16 }
   0x4   :  { %20 = dma.hbm_to_vmem [thread:$0]  %s16_s11, 64, %s18_s13, [#allocation4]  }
   0x5   :  { %s203_s17 = smov [#allocation6]  }
   0x6   :  { %s28_s18 = sshll.u32 %s203_s17, 4  ;;  %s29_s18 = int_to_ptr.vmem [resolvable:$true] %s28_s18 }
   0x7   :  { %31 = dma.hbm_to_vmem [thread:$0]  %s27_s16, 16, %s29_s18, [#allocation7]  }
   0x8   :  { %196 = dma.done.wait [#allocation4], 64  }
   0x9   :  { %197 = vsyncadd [#allocation4], 4294967232 }
   0xa   :  { %198 = dma.done.wait [#allocation7], 16  }
   0xb   :  { %199 = vsyncadd [#allocation7], 4294967280  ;;  %v204_v0 = vmov 0.0   ;;  %vm47_vm0 = vcmask 1042432   ;;  %v46_v1 = vld [vmem:[#allocation3] sm:$0x7]  ;;  %v67_v6 = vlaneseq }
   0xc   :  { %44 = vst [vmem:[#allocation2] sm:$0x1] %v204_v0  ;;  %v48_v2 = vsel %vm47_vm0, %v46_v1, -inf  ;;  %v131_v10 = vld [vmem:[#allocation6] ss:$0 sm:$0xff]  ;;  %vm94_vm3 = vcmask 1040384  }
   0xd   :  { %v49_v3 = vrot.slane %v48_v2, 4  ;;  %v68_v9 = vshrl.u32 %v67_v6, 7  ;;  %v83_v29 = vand.u32 127, %v67_v6  ;;  %s113_s19 = sshll.u32 %s235_s2, 4  ;;  %s205_s22 = smov [#allocation8]   ;;  %s114_s19 = int_to_ptr.hbm [resolvable:$true] %s113_s19 }
   0xf   :  { %v50_v4 = vmax.f32 %v48_v2, %v49_v3  ;;  %vm71_vm1 = vcmp.eq.s32.totalorder %v68_v9, %v131_v10  ;;  %vm86_vm2 = vcmp.lt.s32.totalorder %v83_v29, 8 }
  0x11   :  { %v51_v5 = vrot.slane %v50_v4, 2 }
  0x13   :  { %v52_v7 = vmax.f32 %v50_v4, %v51_v5  ;;  %v45_v33 = vld [vmem:[#allocation2] sm:$0x1] }
  0x15   :  { %v53_v8 = vrot.slane %v52_v7, 1 }
  0x17   :  { %v54_v11 = vmax.f32 %v52_v7, %v53_v8 }
  0x19   :  { %v55_v12 = vsub.f32 %v46_v1, %v54_v11 }
  0x1b   :  { %v56_v13 = vmul.f32 1.442695, %v55_v12  ;;  %v72_v14 = vsel %vm71_vm1, %v55_v12, 0.0 }
  0x1c   :  { %v73_v15 = vsel %vm47_vm0, %v72_v14, 0.0 }
  0x1d   :  { %132 = vpow2.f32 %v56_v13  ;;  %v74_v16 = vrot.slane %v73_v15, 4 }
  0x1f   :  { %v75_v20 = vadd.f32 %v74_v16, %v73_v15 }
  0x21   :  { %v76_v23 = vrot.slane %v75_v20, 2 }
  0x23   :  { %v133_v17 = vpop.eup %132  ;;  %v77_v26 = vadd.f32 %v76_v23, %v75_v20 }
  0x24   :  { %v58_v18 = vsel %vm47_vm0, %v133_v17, 0.0 }
  0x25   :  { %v59_v19 = vrot.slane %v58_v18, 4  ;;  %v78_v28 = vrot.slane %v77_v26, 1 }
  0x27   :  { %v60_v21 = vadd.f32 %v59_v19, %v58_v18  ;;  %v79_v30 = vadd.f32 %v78_v28, %v77_v26 }
  0x29   :  { %v61_v22 = vrot.slane %v60_v21, 2 }
  0x2b   :  { %v62_v24 = vadd.f32 %v61_v22, %v60_v21 }
  0x2d   :  { %v63_v25 = vrot.slane %v62_v24, 1 }
  0x2f   :  { %v64_v27 = vadd.f32 %v63_v25, %v62_v24 }
  0x31   :  { %134 = vlog2.f32 %v64_v27 }
  0x37   :  { %v135_v31 = vpop.eup %134 }
  0x38   :  { %v66_v32 = vmul.f32 0.6931472, %v135_v31 }
  0x3a   :  { %v80_v34 = vsub.f32 %v66_v32, %v79_v30 }
  0x3c   :  { %v87_v35 = vsel %vm86_vm2, %v80_v34, 0.0 }
  0x3d   :  { %v88_v36 = vadd.f32 %v87_v35, %v45_v33 }
  0x3f   :  { %89 = vst [vmem:[#allocation2] sm:$0x1] %v88_v36 }
  0x46   :  { %v93_v37 = vld [vmem:[#allocation2] sm:$0x1] }
  0x47   :  { %v95_v38 = vsel %vm94_vm3, %v93_v37, 0.0 }
  0x48   :  { %96 = vadd.xlane.f32.xlu0 %v95_v38 }
  0xbb   :  { %v97_v39 = vpop.xlane.xlu0 %96 }
  0xbc   :  { %v98_v40 = vrot.slane %v97_v39, 4 }
  0xbe   :  { %v99_v41 = vadd.f32 %v98_v40, %v97_v39 }
  0xc0   :  { %v100_v42 = vrot.slane %v99_v41, 2 }
  0xc2   :  { %v101_v43 = vadd.f32 %v100_v42, %v99_v41 }
  0xc4   :  { %v102_v44 = vrot.slane %v101_v43, 1 }
  0xc6   :  { %v103_v45 = vadd.f32 %v102_v44, %v101_v43 }
  0xc8   :  { %125 = vpush %v103_v45 }
  0xf9   :  { %s126_s20 = spop %125 }
  0xfa   :  { %s105_s21 = smul.f32 0.125, %s126_s20 }
  0xfc   :  { %107 = sst [smem:[#allocation8]] %s105_s21 }
  0xfd   :  { %116 = dma.smem_to_hbm %s205_s22, 16, %s114_s19, [#allocation5]  }
  0xfe   :  { %200 = dma.done.wait [#allocation5], 16  }
  0xff   :  { %201 = vsyncadd [#allocation5], 4294967280 }
 0x100   :  { %121 = sfence }
 0x101   :  { %122 = vsyncpa [#allocation4], 1 }
 0x102   :  { %123 = vsyncpa [#allocation7], 1 }
 0x103   :  { %124 = vsyncpa [#allocation5], 1 }

</bundles_post_ra>
